<compile_context>
chip_gen: v6e
topology: v6e:2x2x1
jax: 0.10.0
libtpu: 0.0.40
codegen_flags: <defaults>
</compile_context>

<pallas_src>
import functools
import math

import jax
import jax.numpy as jnp
from jax.experimental import pallas as pl
from jax.experimental.pallas import tpu as pltpu


def _posenc_kernel(x_ref, g_ref, freq_ref, off_ref, o_ref):
    # x_ref:    (TN, k*C)   k packed input rows per kernel row
    # g_ref:    (k*C, k*D)  block-diagonal one-hot channel->lane replication
    # freq_ref: (1,  k*D)   per-lane frequency 2^(o+1) * pi
    # off_ref:  (1,  k*D)   pi/2 on cos lanes, 0 on sin lanes
    # o_ref:    (TN, k*D)   output = sin((x @ G) * freq + off)
    xg = jnp.dot(x_ref[...], g_ref[...], preferred_element_type=jnp.float32)
    o_ref[...] = jnp.sin(xg * freq_ref[...] + off_ref[...]).astype(o_ref.dtype)


def _vmem_capacity_bytes() -> int:
    try:
        cap = int(getattr(pltpu.get_tpu_info(), "vmem_capacity_bytes", 0))
        if cap > 0:
            return cap
    except Exception:
        pass
    return 64 * 1024 * 1024  # conservative fallback (v7x per-core VMEM)


def _choose_row_tile(n_rows: int, kc: int, kd: int):
    """Row tile + vmem limit.

    Budget ~1/4 of physical VMEM for the double-buffered (in + out) blocks so
    each output block lands in the multi-MiB range on every generation
    (v7x: 64 MiB -> ~16 MiB of blocks; v5e/v6e: 128 MiB -> ~32 MiB).
    """
    cap = _vmem_capacity_bytes()
    budget = cap // 4
    per_row = 8 * (kc + kd)                  # f32, 2 buffers each for in & out
    tn = max(8, budget // per_row)
    tn = (tn // 8) * 8
    if n_rows <= tn:
        tn = n_rows                          # single block (== full dim is legal)
    footprint = 8 * (tn * (kc + kd) + kc * kd + 2 * kd)   # blocks + constants
    vmem_limit = int(min(cap * 3 // 4, max(footprint + (16 << 20), 32 << 20)))
    return int(tn), vmem_limit


@functools.partial(jax.jit, static_argnames=("num_octaves",))
def positional_encoding(samples, num_octaves: int):
    samples = jnp.asarray(samples, jnp.float32)
    if samples.ndim == 1:
        samples = samples[None, :]

    *lead, C = samples.shape
    O = num_octaves
    D = 2 * O * C                            # output features per input row
    k = 128 // math.gcd(D, 128)              # rows packed per kernel row
    kC, kD = k * C, k * D                    # kD % 128 == 0 -> lane-dense stores

    x2d = samples.reshape(-1, C)
    R = x2d.shape[0]
    Rp = ((R + k - 1) // k) * k
    if Rp != R:                              # minimal row padding for ragged R
        x2d = jnp.concatenate(
            [x2d, jnp.zeros((Rp - R, C), jnp.float32)], axis=0)
    Rk = Rp // k
    xp = x2d.reshape(Rk, kC)                 # free contiguous reshape

    TN, vmem_limit = _choose_row_tile(Rk, kC, kD)
    grid = (pl.cdiv(Rk, TN),)

    # Packed lane d: sub-row j = d // D; within-row lane dd = d % D encodes
    # dd = 2*(c*O + o) + s with s==0 -> sin, s==1 -> cos (torch stack order).
    lane = jnp.arange(kD)
    dd = lane % D
    col_of_lane = (lane // D) * C + (dd // 2) // O           # input column
    o_of_lane = (dd // 2) % O                                # octave index
    g_mat = (jnp.arange(kC)[:, None] == col_of_lane[None, :]).astype(jnp.float32)
    freq = ((2.0 ** (o_of_lane + 1).astype(jnp.float32)) * jnp.pi)
    freq = freq.astype(jnp.float32)[None, :]                 # (1, kD)
    off = jnp.where(dd % 2 == 1, jnp.pi / 2, 0.0).astype(jnp.float32)[None, :]

    out_p = pl.pallas_call(
        _posenc_kernel,
        out_shape=jax.ShapeDtypeStruct((Rk, kD), jnp.float32),
        grid_spec=pltpu.PrefetchScalarGridSpec(
            num_scalar_prefetch=0,
            grid=grid,
            in_specs=[
                pl.BlockSpec((TN, kC), lambda i: (i, 0)),
                pl.BlockSpec((kC, kD), lambda i: (0, 0)),
                pl.BlockSpec((1, kD), lambda i: (0, 0)),
                pl.BlockSpec((1, kD), lambda i: (0, 0)),
            ],
            out_specs=pl.BlockSpec((TN, kD), lambda i: (i, 0)),
        ),
        compiler_params=pltpu.CompilerParams(
            dimension_semantics=("parallel",),
            vmem_limit_bytes=vmem_limit),
    )(xp, g_mat, freq, off)

    out = out_p.reshape(Rp, D)               # free contiguous reshape
    if Rp != R:
        out = out[:R]
    return out.reshape(*lead, D)


def _reference(samples, num_octaves: int):
    samples = jnp.asarray(samples, jnp.float32)
    if samples.ndim == 1:
        samples = samples[None, :]
    O = num_octaves
    freq = (2.0 ** jnp.arange(1, O + 1, dtype=jnp.float32)) * jnp.pi
    phase = samples[..., None] * freq        # (..., C, O)
    lead = phase.shape[:-2]
    co = phase.shape[-2] * phase.shape[-1]
    sin = jnp.sin(phase).reshape(*lead, co)
    cos = jnp.cos(phase).reshape(*lead, co)
    return jnp.stack([sin, cos], axis=-1).reshape(*lead, 2 * co)


if __name__ == "__main__":
    num_octaves = 6
    key = jax.random.PRNGKey(0)
    # Coordinates in [0, 1): (batch=2, num_points=16, channels=4), channels-last.
    x = jax.random.uniform(key, (2, 16, 4), dtype=jnp.float32)

    out = positional_encoding(x, num_octaves)
    jax.block_until_ready(out)

    ref = _reference(x, num_octaves)
    assert out.shape == ref.shape == (2, 16, 2 * num_octaves * 4), out.shape
    # cos lanes are evaluated as sin(phase + pi/2); at |phase| ~ 2^O * pi the
    # f32 rounding of the shifted argument gives ~1e-5-scale absolute diffs.
    err = float(jnp.max(jnp.abs(out - ref)))
    assert jnp.allclose(out, ref, atol=1e-4, rtol=1e-5), err

    # Ragged row count (exercises the minimal-row-padding path) and 1-D input.
    x_rag = jax.random.uniform(jax.random.PRNGKey(1), (3, 5, 4), jnp.float32)
    out_rag = positional_encoding(x_rag, num_octaves)
    assert jnp.allclose(out_rag, _reference(x_rag, num_octaves),
                        atol=1e-4, rtol=1e-5)
    x_1d = jax.random.uniform(jax.random.PRNGKey(2), (4,), jnp.float32)
    out_1d = positional_encoding(x_1d, num_octaves)
    assert jnp.allclose(out_1d, _reference(x_1d, num_octaves),
                        atol=1e-4, rtol=1e-5)

    print("KERNEL_OK")
</pallas_src>

<mosaic_0001>
module attributes {stable_mosaic.version = 11 : i64} {
  func.func @_posenc_kernel(%arg0: i32, %arg1: memref<4x32xf32, #tpu.memory_space<vmem>>, %arg2: memref<32x384xf32, #tpu.memory_space<vmem>>, %arg3: memref<1x384xf32, #tpu.memory_space<vmem>>, %arg4: memref<1x384xf32, #tpu.memory_space<vmem>>, %arg5: memref<4x384xf32, #tpu.memory_space<vmem>>) attributes {dimension_semantics = [#tpu.dimension_semantics<parallel>], iteration_bounds = array<i64: 1>, scalar_prefetch = 0 : i64, scratch_operands = 0 : i64, tpu.core_type = #tpu.core_type<tc>, window_params = [{transform_indices = @transform_0, window_bounds = array<i64: 4, 32>}, {pipeline_mode = #tpu.pipeline_mode<synchronous>, transform_indices = @transform_1, window_bounds = array<i64: 32, 384>}, {pipeline_mode = #tpu.pipeline_mode<synchronous>, transform_indices = @transform_2, window_bounds = array<i64: 1, 384>}, {pipeline_mode = #tpu.pipeline_mode<synchronous>, transform_indices = @transform_3, window_bounds = array<i64: 1, 384>}, {transform_indices = @transform_4, window_bounds = array<i64: 4, 384>}]} {
    %c0 = arith.constant 0 : index
    %c0_0 = arith.constant 0 : index
    %0 = vector.load %arg1[%c0, %c0_0] : memref<4x32xf32, #tpu.memory_space<vmem>>, vector<4x32xf32>
    %c0_1 = arith.constant 0 : index
    %c0_2 = arith.constant 0 : index
    %1 = vector.load %arg2[%c0_1, %c0_2] : memref<32x384xf32, #tpu.memory_space<vmem>>, vector<32x384xf32>
    %cst = arith.constant dense<0.000000e+00> : vector<4x384xf32>
    %2 = tpu.matmul %0, %1, %cst {dimension_numbers = #tpu.dot_dimension_numbers<[1], [0], [0], [1], [0, 0, 1, 1], [], []>} : vector<4x32xf32>, vector<32x384xf32>, vector<4x384xf32> -> vector<4x384xf32>
    %c0_3 = arith.constant 0 : index
    %c0_4 = arith.constant 0 : index
    %3 = vector.load %arg3[%c0_3, %c0_4] : memref<1x384xf32, #tpu.memory_space<vmem>>, vector<1x384xf32>
    %4 = vector.broadcast %3 : vector<1x384xf32> to vector<4x384xf32>
    %5 = arith.mulf %2, %4 : vector<4x384xf32>
    %c0_5 = arith.constant 0 : index
    %c0_6 = arith.constant 0 : index
    %6 = vector.load %arg4[%c0_5, %c0_6] : memref<1x384xf32, #tpu.memory_space<vmem>>, vector<1x384xf32>
    %7 = vector.broadcast %6 : vector<1x384xf32> to vector<4x384xf32>
    %8 = arith.addf %5, %7 : vector<4x384xf32>
    %9 = math.sin %8 : vector<4x384xf32>
    %c0_7 = arith.constant 0 : index
    %c0_8 = arith.constant 0 : index
    %10 = vector.load %arg5[%c0_7, %c0_8] : memref<4x384xf32, #tpu.memory_space<vmem>>, vector<4x384xf32>
    tpu.vector_store %arg5[%c0_7, %c0_8], %9 {strides = array<i32>} : memref<4x384xf32, #tpu.memory_space<vmem>>, vector<4x384xf32>,
    return
  }
  func.func @transform_0(%arg0: i32) -> (i32, i32) {
    %c0_i32 = arith.constant 0 : i32
    %c0_i32_0 = arith.constant 0 : i32
    return %arg0, %c0_i32 : i32, i32
  }
  func.func @transform_1(%arg0: i32) -> (i32, i32) {
    %c0_i32 = arith.constant 0 : i32
    %c0_i32_0 = arith.constant 0 : i32
    %c0_i32_1 = arith.constant 0 : i32
    return %c0_i32, %c0_i32_0 : i32, i32
  }
  func.func @transform_2(%arg0: i32) -> (i32, i32) {
    %c0_i32 = arith.constant 0 : i32
    %c0_i32_0 = arith.constant 0 : i32
    %c0_i32_1 = arith.constant 0 : i32
    return %c0_i32, %c0_i32_0 : i32, i32
  }
  func.func @transform_3(%arg0: i32) -> (i32, i32) {
    %c0_i32 = arith.constant 0 : i32
    %c0_i32_0 = arith.constant 0 : i32
    %c0_i32_1 = arith.constant 0 : i32
    return %c0_i32, %c0_i32_0 : i32, i32
  }
  func.func @transform_4(%arg0: i32) -> (i32, i32) {
    %c0_i32 = arith.constant 0 : i32
    %c0_i32_0 = arith.constant 0 : i32
    return %arg0, %c0_i32 : i32, i32
  }
}

</mosaic_0001>

<bundles_post_ra>
// kernel: positional_encoding.1
= control target key start
LH: loop header
LB: loop body
LE: loop exit
PB: predicated region body
PF: predicated region fallthrough
CT: control target
= control target key end

     0   :  { %v599_v0 = vmov 0.0   ;;  %vm600_vm0 = vmmov 0   ;;  %vm30_vm1 = vcmask 261120   ;;  %v177_v14 = vlaneseq  ;;  %s863_s1 = inlined_call_operand.vmem [shape: f32[32,384], index: 1, kind: input, shape index: {}]   ;;  %s864_s0 = inlined_call_operand.vmem [shape: f32[4,32], index: 0, kind: input, shape index: {}]   ;;  %s865_s2 = inlined_call_operand.vmem [shape: f32[1,384], index: 2, kind: input, shape index: {}]   ;;  %s866_s3 = inlined_call_operand.vmem [shape: f32[1,384], index: 3, kind: input, shape index: {}]   ;;  %s867_s4 = inlined_call_operand.vmem [shape: f32[4,384], index: 4, kind: output, shape index: {}]  }
   0x1   :  { %556 = vmatprep.subr.mxu1 %v599_v0  ;;  %v28_v1 = vld [vmem:[%s863_s1 + $0x50] sm:$0xff]  ;;  %v29_v2 = vld [vmem:[%s863_s1 + $0x58] sm:$0xff]  ;;  %v27_v3 = vld [vmem:[%s863_s1 + $0x48] sm:$0xff]  ;;  %564 = vmatprep.mubr.msk.f32.mxu1 %vm600_vm0, %v599_v0  ;;  %v601_v62 = vmov 683565275  }
   0x2   :  { %58 = vmatprep.subr.mxu0 %v28_v1  ;;  %557 = vmatpush3.msra.mxu1 %v29_v2  ;;  %v25_v4 = vld [vmem:[%s863_s1 + $0x38] sm:$0xff]  ;;  %v26_v5 = vld [vmem:[%s863_s1 + $0x40] sm:$0xff]  ;;  %v24_v6 = vld [vmem:[%s863_s1 + $0x30] sm:$0xff]  ;;  %v178_v15 = vshrl.u32 %v177_v14, 7  ;;  %v603_v2 = vmov 2131351028  }
   0x3   :  { %59 = vmatpush1.msra.mxu0 %v27_v3  ;;  %558 = vmatprep.subr.mxu1 %v599_v0  ;;  %v22_v7 = vld [vmem:[%s863_s1 + $0x20] sm:$0xff]  ;;  %v23_v8 = vld [vmem:[%s863_s1 + $0x28] sm:$0xff]  ;;  %v21_v9 = vld [vmem:[%s863_s1 + $0x18] sm:$0xff] }
   0x4   :  { %60 = vmatprep.subr.mxu0 %v25_v4  ;;  %559 = vmatpush3.msra.mxu1 %v26_v5  ;;  %v19_v10 = vld [vmem:[%s863_s1 + $0x8] sm:$0xff]  ;;  %v20_v11 = vld [vmem:[%s863_s1 + $0x10] sm:$0xff]  ;;  %v18_v12 = vld [vmem:[%s863_s1] sm:$0xff]  ;;  %v187_v16 = vsub.s32 2, %v178_v15  ;;  %v179_v17 = vsub.s32 0, %v178_v15  ;;  %v183_v19 = vsub.s32 1, %v178_v15 }
   0x5   :  { %61 = vmatpush1.msra.mxu0 %v24_v6  ;;  %560 = vmatprep.subr.mxu1 %v599_v0  ;;  %v17_v13 = vld [vmem:[%s864_s0] sm:$0xf]  ;;  %v604_v4 = vmov 2102212464   ;;  %v605_v6 = vmov 920167782  }
   0x6   :  { %62 = vmatprep.subr.mxu0 %v22_v7  ;;  %561 = vmatpush3.msra.mxu1 %v23_v8  ;;  %v175_v18 = vld [vmem:[%s865_s2] sm:$0x7]  ;;  %v606_v15 = vmov 1326507024  }
   0x7   :  { %63 = vmatpush1.msra.mxu0 %v21_v9  ;;  %562 = vmatprep.subr.mxu1 %v599_v0  ;;  %v195_v20 = vld [vmem:[%s866_s3] sm:$0x7]  ;;  %v188_v21 = vrot.slane %v175_v18, %v187_v16  ;;  %v180_v22 = vrot.slane %v175_v18, %v179_v17  ;;  %v184_v25 = vrot.slane %v175_v18, %v183_v19 }
   0x8   :  { %64 = vmatprep.subr.mxu0 %v19_v10  ;;  %563 = vmatpush3.msra.mxu1 %v20_v11  ;;  %v208_v23 = vrot.slane %v195_v20, %v187_v16  ;;  %v200_v24 = vrot.slane %v195_v20, %v179_v17  ;;  %v204_v35 = vrot.slane %v195_v20, %v183_v19 }
   0x9   :  { %65 = vmatpush1.msra.mxu0 %v18_v12  ;;  %98 = vmatprep.mubr.f32.mxu0 %v599_v0  ;;  %v602_v0 = vmov 2475754826  }
   0xa   :  { %565 = vmatmul.mubr.msk.f32.vlgmr.msra.gmra.mxu1 %vm30_vm1, %v17_v13  ;;  %537 = vmatmul.mubr.msk.f32.vlgmr.msra.gmra.mxu0 %vm30_vm1, %v17_v13 }
  0xca   :  { %v171_v26 = vpop.f32.mrf.mxu1  ;;  %v100_v27 = vpop.f32.mrf.mxu0 }
  0xcb   :  { %v194_v28 = vmul.f32 %v188_v21, %v171_v26  ;;  %v192_v29 = vmul.f32 %v180_v22, %v100_v27 }
  0xcc   :  { %v102_v30 = vpop.f32.mrf.mxu0  ;;  %v566_v31 = vpop.f32.mrf.mxu1 }
  0xcd   :  { %v677_v32 = vadd.f32 %v208_v23, %v194_v28  ;;  %v679_v33 = vadd.f32 %v200_v24, %v192_v29  ;;  %v193_v34 = vmul.f32 %v184_v25, %v102_v30 }
  0xcf   :  { %v423_v36 = vand.u32 2147483647, %v677_v32  ;;  %v426_v37 = vand.u32 2139095040, %v677_v32  ;;  %v215_v38 = vand.u32 2147483647, %v679_v33  ;;  %v218_v39 = vand.u32 2139095040, %v679_v33 }
  0xd0   :  { %v685_v41 = vadd.f32 %v204_v35, %v193_v34 }
  0xd1   :  { %v427_v40 = vshrl.u32 %v426_v37, 23  ;;  %v430_v42 = vand.u32 8388607, %v423_v36  ;;  %v219_v43 = vshrl.u32 %v218_v39, 23  ;;  %v222_v44 = vand.u32 8388607, %v215_v38 }
  0xd2   :  { %v322_v47 = vand.u32 2139095040, %v685_v41 }
  0xd3   :  { %v547_v45 = vadd.s32 4294967169, %v427_v40  ;;  %v539_v46 = vadd.s32 4294967169, %v219_v43  ;;  %v431_v49 = vor.u32 8388608, %v430_v42  ;;  %v223_v50 = vor.u32 8388608, %v222_v44 }
  0xd4   :  { %v323_v52 = vshrl.u32 %v322_v47, 23 }
  0xd5   :  { %v433_v48 = vadd.s32 1, %v547_v45  ;;  %v225_v51 = vadd.s32 1, %v539_v46  ;;  %v692_v58 = vshll.u32 %v431_v49, 8  ;;  %v694_v60 = vshll.u32 %v223_v50, 8 }
  0xd6   :  { %v543_v54 = vadd.s32 4294967169, %v323_v52 }
  0xd7   :  { %vm434_vm2 = vcmp.gt.s32.totalorder %v433_v48, 0  ;;  %vm226_vm3 = vcmp.gt.s32.totalorder %v225_v51, 0 }
  0xd8   :  { %v435_v53 = vsel %vm434_vm2, %v433_v48, 0  ;;  %v227_v56 = vsel %vm226_vm3, %v225_v51, 0  ;;  %v703_v9 = vadd.s32 1, %v543_v54 }
  0xd9   :  { %v437_v55 = vand.u32 31, %v435_v53  ;;  %v436_v57 = vshrl.u32 %v435_v53, 5  ;;  %v229_v59 = vand.u32 31, %v227_v56  ;;  %v701_v8 = vshrl.u32 %v227_v56, 5 }
  0xda   :  { %vm330_vm13 = vcmp.gt.s32.totalorder %v703_v9, 0 }
  0xdb   :  { %v438_v61 = vsub.s32 32, %v437_v55  ;;  %v440_v63 = vshll.u32 %v601_v62, %v437_v55  ;;  %v443_v1 = vshll.u32 %v602_v0, %v437_v55  ;;  %v446_v3 = vshll.u32 %v603_v2, %v437_v55 }
  0xdc   :  { %v449_v5 = vshll.u32 %v604_v4, %v437_v55  ;;  %v452_v7 = vshll.u32 %v605_v6, %v437_v55  ;;  %vm455_vm4 = vcmp.lt.s32.totalorder %v436_v57, 1  ;;  %vm458_vm5 = vcmp.lt.s32.totalorder %v436_v57, 4 }
  0xdd   :  { %v439_v10 = vshrl.u32 %v601_v62, %v438_v61  ;;  %v441_v11 = vshrl.u32 %v602_v0, %v438_v61  ;;  %v444_v12 = vshrl.u32 %v603_v2, %v438_v61  ;;  %v447_v13 = vshrl.u32 %v604_v4, %v438_v61 }
  0xde   :  { %v450_v14 = vshrl.u32 %v605_v6, %v438_v61  ;;  %v453_v16 = vshrl.u32 %v606_v15, %v438_v61  ;;  %v230_v20 = vsub.s32 32, %v229_v59  ;;  %vm456_vm6 = vcmp.lt.s32.totalorder %v436_v57, 2 }
  0xdf   :  { %v442_v17 = vor.u32 %v441_v11, %v440_v63  ;;  %v445_v18 = vor.u32 %v444_v12, %v443_v1  ;;  %v448_v19 = vor.u32 %v447_v13, %v446_v3  ;;  %vm457_vm7 = vcmp.lt.s32.totalorder %v436_v57, 3 }
  0xe0   :  { %v451_v21 = vor.u32 %v450_v14, %v449_v5  ;;  %v454_v22 = vor.u32 %v453_v16, %v452_v7  ;;  %v232_v30 = vshll.u32 %v601_v62, %v229_v59  ;;  %v233_v35 = vshrl.u32 %v602_v0, %v230_v20 }
  0xe1   :  { %v459_v23 = vsel %vm455_vm4, %v439_v10, %v442_v17  ;;  %v460_v24 = vsel %vm458_vm5, %v448_v19, 2102212464  ;;  %v463_v25 = vsel %vm455_vm4, %v442_v17, %v445_v18  ;;  %v467_v26 = vsel %vm455_vm4, %v445_v18, %v448_v19 }
  0xe2   :  { %v461_v27 = vsel %vm457_vm7, %v445_v18, %v460_v24  ;;  %v464_v28 = vsel %vm458_vm5, %v451_v21, 920167782  ;;  %v468_v29 = vsel %vm458_vm5, %v454_v22, 1326507024  ;;  %v235_v37 = vshll.u32 %v602_v0, %v229_v59 }
  0xe3   :  { %v465_v31 = vsel %vm457_vm7, %v448_v19, %v464_v28  ;;  %v469_v34 = vsel %vm457_vm7, %v451_v21, %v468_v29  ;;  %v462_v39 = vsel %vm456_vm6, %v459_v23, %v461_v27  ;;  %v236_v43 = vshrl.u32 %v603_v2, %v230_v20 }
  0xe4   :  { %v466_v40 = vsel %vm456_vm6, %v463_v25, %v465_v31  ;;  %v470_v42 = vsel %vm456_vm6, %v467_v26, %v469_v34  ;;  %v234_v48 = vor.u32 %v233_v35, %v232_v30  ;;  %v238_v50 = vshll.u32 %v603_v2, %v229_v59 }
  0xe5   :  { %v719_v44 = vmul.u32.u64.low %v692_v58, %v470_v42  ;;  %v720_v45 = vmul.u32.u64.high %v692_v58, %v470_v42, %v719_v44  ;;  %v723_v46 = vmul.u32.u64.low %v692_v58, %v466_v40  ;;  %v724_v47 = vmul.u32.u64.high %v692_v58, %v466_v40, %v723_v46 }
  0xe6   :  { %v237_v49 = vor.u32 %v236_v43, %v235_v37  ;;  %v239_v51 = vshrl.u32 %v604_v4, %v230_v20  ;;  %v231_v52 = vshrl.u32 %v601_v62, %v230_v20  ;;  %v241_v53 = vshll.u32 %v604_v4, %v229_v59 }
  0xe7   :  { %v242_v54 = vshrl.u32 %v605_v6, %v230_v20  ;;  %v245_v55 = vshrl.u32 %v606_v15, %v230_v20  ;;  %v478_v56 = vmul.u32 %v692_v58, %v462_v39  ;;  %v244_v61 = vshll.u32 %v605_v6, %v229_v59 }
  0xe8   :  { %v240_v57 = vor.u32 %v239_v51, %v238_v50  ;;  %vm247_vm8 = vcmp.lt.s32.totalorder %v701_v8, 1  ;;  %vm480_vm9 = vc.u32 %v720_v45, %v723_v46  ;;  %v481_v63 = vadd.s32 1, %v724_v47 }
  0xe9   :  { %v243_v1 = vor.u32 %v242_v54, %v241_v53  ;;  %vm248_vm10 = vcmp.lt.s32.totalorder %v701_v8, 2  ;;  %v246_v3 = vor.u32 %v245_v55, %v244_v61  ;;  %vm249_vm11 = vcmp.lt.s32.totalorder %v701_v8, 3 }
  0xea   :  { %vm250_vm12 = vcmp.lt.s32.totalorder %v701_v8, 4  ;;  %v255_v5 = vsel %vm247_vm8, %v234_v48, %v237_v49  ;;  %v482_v58 = vsel %vm480_vm9, %v481_v63, %v724_v47  ;;  %v259_v10 = vsel %vm247_vm8, %v237_v49, %v240_v57 }
  0xeb   :  { %v252_v7 = vsel %vm250_vm12, %v240_v57, 2102212464  ;;  %v256_v59 = vsel %vm250_vm12, %v243_v1, 920167782  ;;  %v483_v11 = vadd.s32 %v482_v58, %v478_v56  ;;  %v251_v12 = vsel %vm247_vm8, %v231_v52, %v234_v48 }
  0xec   :  { %v257_v13 = vsel %vm249_vm11, %v240_v57, %v256_v59  ;;  %v260_v14 = vsel %vm250_vm12, %v246_v3, 1326507024  ;;  %v253_v16 = vsel %vm249_vm11, %v237_v49, %v252_v7  ;;  %v331_v25 = vsel %vm330_vm13, %v703_v9, 0 }
  0xed   :  { %v258_v17 = vsel %vm248_vm10, %v255_v5, %v257_v13  ;;  %v261_v18 = vsel %vm249_vm11, %v243_v1, %v260_v14  ;;  %v484_v19 = vadd.s32 536870912, %v483_v11  ;;  %v254_v27 = vsel %vm248_vm10, %v251_v12, %v253_v16 }
  0xee   :  { %v262_v20 = vsel %vm248_vm10, %v259_v10, %v261_v18  ;;  %v749_v21 = vmul.u32.u64.low %v694_v60, %v258_v17  ;;  %v750_v22 = vmul.u32.u64.high %v694_v60, %v258_v17, %v749_v21  ;;  %v333_v28 = vand.u32 31, %v331_v25 }
  0xef   :  { %v754_v23 = vmul.u32.u64.low %v694_v60, %v262_v20  ;;  %v755_v24 = vmul.u32.u64.high %v694_v60, %v262_v20, %v754_v23  ;;  %v758_v26 = vshrl.u32 %v484_v19, 30  ;;  %v270_v31 = vmul.u32 %v694_v60, %v254_v27 }
  0xf0   :  { %v273_v30 = vadd.s32 1, %v750_v22  ;;  %v319_v34 = vand.u32 2147483647, %v685_v41  ;;  %v334_v35 = vsub.s32 32, %v333_v28  ;;  %v332_v50 = vshrl.u32 %v331_v25, 5 }
  0xf1   :  { %v486_v29 = vshll.u32 %v758_v26, 30  ;;  %vm272_vm14 = vc.u32 %v755_v24, %v749_v21  ;;  %v336_v51 = vshll.u32 %v601_v62, %v333_v28  ;;  %v339_v52 = vshll.u32 %v602_v0, %v333_v28 }
  0xf2   :  { %v274_v9 = vsel %vm272_vm14, %v273_v30, %v750_v22  ;;  %v326_v42 = vand.u32 8388607, %v319_v34  ;;  %v337_v43 = vshrl.u32 %v602_v0, %v334_v35  ;;  %v340_v44 = vshrl.u32 %v603_v2, %v334_v35 }
  0xf3   :  { %v487_v37 = vsub.s32 %v483_v11, %v486_v29  ;;  %v275_v39 = vadd.s32 %v274_v9, %v270_v31  ;;  %v343_v47 = vshrl.u32 %v604_v4, %v334_v35  ;;  %v346_v48 = vshrl.u32 %v605_v6, %v334_v35 }
  0xf4   :  { %v342_v54 = vshll.u32 %v603_v2, %v333_v28  ;;  %v345_v55 = vshll.u32 %v604_v4, %v333_v28  ;;  %v349_v56 = vshrl.u32 %v606_v15, %v334_v35  ;;  %v327_v61 = vor.u32 8388608, %v326_v42 }
  0xf5   :  { %v489_v40 = vsub.s32 0, %v487_v37  ;;  %v276_v8 = vadd.s32 536870912, %v275_v39  ;;  %v338_v63 = vor.u32 %v337_v43, %v336_v51  ;;  %v341_v1 = vor.u32 %v340_v44, %v339_v52 }
  0xf6   :  { %v344_v5 = vor.u32 %v343_v47, %v342_v54  ;;  %v347_v58 = vor.u32 %v346_v48, %v345_v55  ;;  %v348_v7 = vshll.u32 %v605_v6, %v333_v28  ;;  %v479_v0 = vadd.s32 %v723_v46, %v720_v45 }
  0xf7   :  { %v548_v60 = vmin.u32 %v489_v40, %v487_v37  ;;  %v775_v49 = vshrl.u32 %v276_v8, 30  ;;  %v335_v2 = vshrl.u32 %v601_v62, %v334_v35  ;;  %vm351_vm15 = vcmp.lt.s32.totalorder %v332_v50, 1 }
  0xf8   :  { %v350_v4 = vor.u32 %v349_v56, %v348_v7  ;;  %vm352_vm1 = vcmp.lt.s32.totalorder %v332_v50, 2  ;;  %vm353_vm2 = vcmp.lt.s32.totalorder %v332_v50, 3  ;;  %vm354_vm3 = vcmp.lt.s32.totalorder %v332_v50, 4 }
  0xf9   :  { %v491_v53 = vclz %v548_v60  ;;  %v278_v57 = vshll.u32 %v775_v49, 30  ;;  %v359_v11 = vsel %vm351_vm15, %v338_v63, %v341_v1  ;;  %v356_v13 = vsel %vm354_vm3, %v344_v5, 2102212464 }
  0xfa   :  { %v360_v14 = vsel %vm354_vm3, %v347_v58, 920167782  ;;  %v363_v16 = vsel %vm351_vm15, %v341_v1, %v344_v5  ;;  %v364_v20 = vsel %vm354_vm3, %v350_v4, 1326507024  ;;  %v355_v23 = vsel %vm351_vm15, %v335_v2, %v338_v63 }
  0xfb   :  { %v549_v3 = vadd.s32 4294967294, %v491_v53  ;;  %v786_v59 = vsub.s32 %v275_v39, %v278_v57  ;;  %v361_v62 = vsel %vm353_vm2, %v344_v5, %v360_v14  ;;  %v367_v25 = vshll.u32 %v327_v61, 8 }
  0xfc   :  { %v362_v19 = vsel %vm352_vm1, %v359_v11, %v361_v62  ;;  %v357_v29 = vsel %vm353_vm2, %v341_v1, %v356_v13  ;;  %v365_v30 = vsel %vm353_vm2, %v347_v58, %v364_v20  ;;  %vm425_vm6 = vcmp.lt.s32.totalorder %v677_v32, 0 }
  0xfd   :  { %vm550_vm0 = vcmp.lt.s32.totalorder %v549_v3, 0  ;;  %v281_v10 = vsub.s32 0, %v786_v59  ;;  %v366_v35 = vsel %vm352_vm1, %v363_v16, %v365_v30  ;;  %v358_v42 = vsel %vm352_vm1, %v355_v23, %v357_v29 }
  0xfe   :  { %v494_v15 = vsel %vm550_vm0, 0, %v549_v3  ;;  %v802_v40 = vmul.u32.u64.low %v367_v25, %v366_v35  ;;  %v803_v8 = vmul.u32.u64.high %v367_v25, %v366_v35, %v802_v40  ;;  %v374_v52 = vmul.u32 %v367_v25, %v358_v42 }
  0xff   :  { %v495_v12 = vsub.s32 32, %v494_v15  ;;  %v499_v6 = vsub.s32 4294967266, %v494_v15  ;;  %v496_v45 = vshll.u32 %v487_v37, %v494_v15  ;;  %v540_v46 = vmin.u32 %v281_v10, %v786_v59 }
 0x100   :  { %v799_v37 = vmul.u32.u64.low %v367_v25, %v362_v19  ;;  %v800_v9 = vmul.u32.u64.high %v367_v25, %v362_v19, %v799_v37  ;;  %v509_v50 = vsub.s32 4, %v758_v26  ;;  %v271_v61 = vadd.s32 %v749_v21, %v755_v24 }
 0x101   :  { %v497_v17 = vshrl.u32 %v479_v0, %v495_v12  ;;  %v500_v18 = vadd.s32 127, %v499_v6  ;;  %v283_v22 = vclz %v540_v46  ;;  %vm815_vm7 = vcmp.le.f32.partialorder %v423_v36, 0.7853982 }
 0x102   :  { %v377_v48 = vadd.s32 1, %v800_v9  ;;  %vm376_vm5 = vc.u32 %v803_v8, %v799_v37  ;;  %v510_v2 = vsel %vm425_vm6, %v509_v50, %v758_v26  ;;  %vm217_vm8 = vcmp.lt.s32.totalorder %v679_v33, 0 }
 0x103   :  { %v498_v27 = vor.u32 %v497_v17, %v496_v45  ;;  %v501_v28 = vshll.u32 %v500_v18, 23  ;;  %v541_v31 = vadd.s32 4294967294, %v283_v22  ;;  %v512_v15 = vsel %vm815_vm7, 0, %v510_v2 }
 0x104   :  { %v378_v55 = vsel %vm376_vm5, %v377_v48, %v800_v9  ;;  %v516_v6 = vadd.s32 3, %v512_v15  ;;  %v375_v23 = vadd.s32 %v799_v37, %v803_v8  ;;  %vm515_vm12 = vweird.f32 %v677_v32 }
 0x105   :  { %v502_v39 = vor.u32 4788187, %v501_v28  ;;  %vm542_vm4 = vcmp.lt.s32.totalorder %v541_v31, 0  ;;  %v505_v44 = vcvt.s32.f32 %v498_v27  ;;  %v379_v57 = vadd.s32 %v378_v55, %v374_v52 }
 0x106   :  { %v286_v60 = vsel %vm542_vm4, 0, %v541_v31  ;;  %v517_v62 = vand.u32 3, %v516_v6  ;;  %vm839_vm14 = vcmp.le.f32.partialorder %v215_v38, 0.7853982  ;;  %vm321_vm15 = vcmp.lt.s32.totalorder %v685_v41, 0 }
 0x107   :  { %v503_v43 = vand.u32 2147483647, %v502_v39  ;;  %v291_v47 = vsub.s32 4294967266, %v286_v60  ;;  %v287_v53 = vsub.s32 32, %v286_v60  ;;  %v380_v5 = vadd.s32 536870912, %v379_v57 }
 0x108   :  { %v288_v21 = vshll.u32 %v786_v59, %v286_v60  ;;  %vm519_vm10 = vcmp.eq.s32.totalorder %v517_v62, 0  ;;  %vm522_vm11 = vcmp.eq.s32.totalorder %v517_v62, 2  ;;  %vm518_vm13 = vcmp.lt.s32.totalorder %v517_v62, 2 }
 0x109   :  { %v506_v51 = vmul.f32 %v505_v44, %v503_v43  ;;  %v292_v54 = vadd.s32 127, %v291_v47  ;;  %v289_v7 = vshrl.u32 %v271_v61, %v287_v53  ;;  %v822_v0 = vshrl.u32 %v380_v5, 30 }
 0x10a   :  { %v301_v60 = vsub.s32 4, %v775_v49  ;;  %vm320_vm0 = vcmp.le.f32.partialorder %v319_v34, 0.7853982 }
 0x10b   :  { %v507_v56 = vxor.u32 2147483648, %v506_v51  ;;  %v293_v63 = vshll.u32 %v292_v54, 23  ;;  %v382_v36 = vshll.u32 %v822_v0, 30  ;;  %v290_v4 = vor.u32 %v289_v7, %v288_v21 }
 0x10c   :  { %v405_v38 = vsub.s32 4, %v822_v0 }
 0x10d   :  { %v508_v3 = vsel %vm425_vm6, %v507_v56, %v506_v51  ;;  %v294_v24 = vor.u32 4788187, %v293_v63  ;;  %v383_v10 = vsub.s32 %v379_v57, %v382_v36  ;;  %v297_v13 = vcvt.s32.f32 %v290_v4 }
 0x10e   :  { %v511_v58 = vsel %vm815_vm7, %v677_v32, %v508_v3  ;;  %v302_v51 = vsel %vm217_vm8, %v301_v60, %v775_v49  ;;  %v406_v55 = vsel %vm321_vm15, %v405_v38, %v822_v0  ;;  %vm307_vm7 = vweird.f32 %v679_v33 }
 0x10f   :  { %587 = vcosq.f32 %v511_v58  ;;  %v295_v11 = vand.u32 2147483647, %v294_v24  ;;  %v385_v12 = vsub.s32 0, %v383_v10  ;;  %v304_v54 = vsel %vm839_vm14, 0, %v302_v51 }
 0x110   :  { %589 = vsinq.f32 %v511_v58  ;;  %v308_v56 = vadd.s32 3, %v304_v54  ;;  %v408_v57 = vsel %vm320_vm0, 0, %v406_v55 }
 0x111   :  { %v544_v14 = vmin.u32 %v385_v12, %v383_v10  ;;  %v298_v45 = vmul.f32 %v297_v13, %v295_v11  ;;  %v412_v63 = vadd.s32 3, %v408_v57 }
 0x112   :  { %v309_v1 = vand.u32 3, %v308_v56 }
 0x113   :  { %v387_v46 = vclz %v544_v14  ;;  %v299_v17 = vxor.u32 2147483648, %v298_v45  ;;  %v413_v5 = vand.u32 3, %v412_v63 }
 0x114   :  { %vm311_vm1 = vcmp.eq.s32.totalorder %v309_v1, 0  ;;  %vm314_vm2 = vcmp.eq.s32.totalorder %v309_v1, 2  ;;  %vm310_vm3 = vcmp.lt.s32.totalorder %v309_v1, 2 }
 0x115   :  { %v545_v26 = vadd.s32 4294967294, %v387_v46  ;;  %v300_v29 = vsel %vm217_vm8, %v299_v17, %v298_v45  ;;  %vm418_vm4 = vcmp.eq.s32.totalorder %v413_v5, 2  ;;  %vm415_vm5 = vcmp.eq.s32.totalorder %v413_v5, 0 }
 0x116   :  { %v303_v8 = vsel %vm839_vm14, %v679_v33, %v300_v29  ;;  %vm414_vm6 = vcmp.lt.s32.totalorder %v413_v5, 2  ;;  %vm411_vm8 = vweird.f32 %v685_v41 }
 0x117   :  { %vm546_vm9 = vcmp.lt.s32.totalorder %v545_v26, 0  ;;  %591 = vcosq.f32 %v303_v8 }
 0x118   :  { %v390_v20 = vsel %vm546_vm9, 0, %v545_v26  ;;  %593 = vsinq.f32 %v303_v8 }
 0x119   :  { %v391_v25 = vsub.s32 32, %v390_v20  ;;  %v395_v27 = vsub.s32 4294967266, %v390_v20  ;;  %v392_v31 = vshll.u32 %v383_v10, %v390_v20 }
 0x11b   :  { %v393_v35 = vshrl.u32 %v375_v23, %v391_v25  ;;  %v396_v9 = vadd.s32 127, %v395_v27 }
 0x11c   :  { %v588_v16 = vpop.eup %587 }
 0x11d   :  { %v590_v59 = vpop.eup %589  ;;  %v523_v18 = vxor.u32 2147483648, %v588_v16  ;;  %v394_v32 = vor.u32 %v393_v35, %v392_v31  ;;  %v397_v40 = vshll.u32 %v396_v9, 23 }
 0x11e   :  { %v520_v19 = vxor.u32 2147483648, %v590_v59 }
 0x11f   :  { %v524_v22 = vsel %vm522_vm11, %v523_v18, %v590_v59  ;;  %v398_v42 = vor.u32 4788187, %v397_v40  ;;  %v401_v44 = vcvt.s32.f32 %v394_v32 }
 0x120   :  { %v521_v28 = vsel %vm519_vm10, %v588_v16, %v520_v19 }
 0x121   :  { %v525_v30 = vsel %vm518_vm13, %v521_v28, %v524_v22  ;;  %v399_v43 = vand.u32 2147483647, %v398_v42 }
 0x122   :  { %v526_v39 = vsel %vm515_vm12, nan, %v525_v30 }
 0x123   :  { %532 = vst [vmem:[%s867_s4 + $0x8] sm:$0xf] %v526_v39  ;;  %v402_v47 = vmul.f32 %v401_v44, %v399_v43 }
 0x124   :  { %v592_v50 = vpop.eup %591 }
 0x125   :  { %v403_v48 = vxor.u32 2147483648, %v402_v47  ;;  %v594_v61 = vpop.eup %593  ;;  %v315_v3 = vxor.u32 2147483648, %v592_v50 }
 0x126   :  { %v312_v49 = vxor.u32 2147483648, %v594_v61 }
 0x127   :  { %v404_v52 = vsel %vm321_vm15, %v403_v48, %v402_v47  ;;  %v316_v7 = vsel %vm314_vm2, %v315_v3, %v594_v61 }
 0x128   :  { %v407_v53 = vsel %vm320_vm0, %v685_v41, %v404_v52  ;;  %v313_v58 = vsel %vm311_vm1, %v592_v50, %v312_v49 }
 0x129   :  { %595 = vcosq.f32 %v407_v53  ;;  %v317_v0 = vsel %vm310_vm3, %v313_v58, %v316_v7 }
 0x12a   :  { %597 = vsinq.f32 %v407_v53  ;;  %v318_v10 = vsel %vm307_vm7, nan, %v317_v0 }
 0x136   :  { %v596_v34 = vpop.eup %595 }
 0x137   :  { %v598_v2 = vpop.eup %597  ;;  %v419_v21 = vxor.u32 2147483648, %v596_v34 }
 0x138   :  { %v416_v24 = vxor.u32 2147483648, %v598_v2 }
 0x139   :  { %v420_v36 = vsel %vm418_vm4, %v419_v21, %v598_v2 }
 0x13a   :  { %v417_v4 = vsel %vm415_vm5, %v596_v34, %v416_v24 }
 0x13b   :  { %v421_v15 = vsel %vm414_vm6, %v417_v4, %v420_v36 }
 0x13c   :  { %v422_v11 = vsel %vm411_vm8, nan, %v421_v15 }
 0x13d   :  { %v529_v12 = vcombine.low %v318_v10, %v422_v11 }
 0x13f   :  { %531 = vst [vmem:[%s867_s4] sm:$0xff] %v529_v12 }

</bundles_post_ra>
